<compile_context>
chip_gen: v5e
topology: v5e:2x2
jax: 0.10.0
libtpu: 0.0.40
codegen_flags: <defaults>
</compile_context>

<pallas_src>
import functools

import jax
import jax.numpy as jnp
from jax import lax
from jax.experimental import pallas as pl
from jax.experimental.pallas import tpu as pltpu

_LANES = 128


def _fold_rows(x):
    """(R, 128) f32 -> (8, 128) f32 via VPU-only row-group adds (R % 8 == 0)."""
    r = x.shape[0]
    return x.reshape(r // 8, 8, x.shape[1]).sum(axis=0)


def _relate_loss_kernel(est_ref, gt_ref, out_ref,
                        acc_e, acc_g, acc_d, acc_d2, acc_c, scale_sm,
                        *, n_valid, rows_block, needs_mask):
    """Two-pass masked reduction.

    VMEM (8,128) f32 accumulators:
      acc_e  = sum(est[gt>0])        acc_g  = sum(gt[gt>0])        (pass 0)
      acc_d  = sum(diff_log)         acc_d2 = sum(diff_log^2)      (pass 1)
      acc_c  = count(valid)
    scale_sm (SMEM f32[1]): global scale = sum_est / sum_gt.
    out_ref  (SMEM f32[3]): [sum_diff, sum_diff_sq, count_valid].
    """
    p = pl.program_id(0)          # pass: 0 = scale sums, 1 = loss sums
    t = pl.program_id(1)          # tile along the flattened pixel axis
    n_t = pl.num_programs(1)

    @pl.when(jnp.logical_and(p == 0, t == 0))
    def _init():
        acc_e[...] = jnp.zeros_like(acc_e)
        acc_g[...] = jnp.zeros_like(acc_g)
        acc_d[...] = jnp.zeros_like(acc_d)
        acc_d2[...] = jnp.zeros_like(acc_d2)
        acc_c[...] = jnp.zeros_like(acc_c)

    est = est_ref[...].astype(jnp.float32)
    gt = gt_ref[...].astype(jnp.float32)

    if needs_mask:
        # Global flat-index mask: handles both lane padding and partial tail
        # tiles (whose out-of-bounds rows contain unspecified data).
        rows = lax.broadcasted_iota(jnp.int32, (rows_block, _LANES), 0)
        lanes = lax.broadcasted_iota(jnp.int32, (rows_block, _LANES), 1)
        flat = (t * rows_block + rows) * _LANES + lanes
        in_bounds = flat < n_valid
    else:
        in_bounds = None

    @pl.when(p == 0)
    def _pass0():
        m = gt > 0.0
        if in_bounds is not None:
            m = jnp.logical_and(m, in_bounds)
        acc_e[...] += _fold_rows(jnp.where(m, est, 0.0))
        acc_g[...] += _fold_rows(jnp.where(m, gt, 0.0))

    @pl.when(jnp.logical_and(p == 1, t == 0))
    def _compute_scale():
        # scale = mean(est[mask]) / mean(gt[mask]) == sum_est / sum_gt
        # (same mask, counts cancel).  One scalar divide for the whole kernel.
        scale_sm[0] = jnp.sum(acc_e[...]) / jnp.sum(acc_g[...])

    @pl.when(p == 1)
    def _pass1():
        scale = scale_sm[0]                      # scalar broadcast multiply
        gt_s = gt * scale
        gt_s = jnp.where(gt_s < 0.0, 0.0, gt_s)  # depth_gt[depth_gt < 0] = 0
        valid = gt_s > 1.0
        if in_bounds is not None:
            valid = jnp.logical_and(valid, in_bounds)
        safe_gt = jnp.where(valid, gt_s, 1.0)
        safe_est = jnp.where(valid, est, 1.0)
        diff = jnp.log(safe_gt) - jnp.log(safe_est)
        dmask = jnp.where(valid, diff, 0.0)
        acc_d[...] += _fold_rows(dmask)
        acc_d2[...] += _fold_rows(dmask * diff)  # diff^2 where valid, else 0
        acc_c[...] += _fold_rows(valid.astype(jnp.float32))

    @pl.when(jnp.logical_and(p == 1, t == n_t - 1))
    def _finalize():
        out_ref[0] = jnp.sum(acc_d[...])
        out_ref[1] = jnp.sum(acc_d2[...])
        out_ref[2] = jnp.sum(acc_c[...])


def _sublane_multiple(dtype):
    # f32 -> 8, bf16/f16 -> 16, int8/fp8 -> 32 (min sublane tiling).
    return max(8, 32 // jnp.dtype(dtype).itemsize)


@functools.partial(jax.jit, static_argnames=("lambd", "rows_cap"))
def relate_loss(depth_est, depth_gt, lambd=0.5, rows_cap=2048):
    est = depth_est.reshape(-1)
    gt = depth_gt.reshape(-1)
    n = est.shape[0]

    sub = max(_sublane_multiple(est.dtype), _sublane_multiple(gt.dtype))
    chunk = sub * _LANES
    n_pad = ((n + chunk - 1) // chunk) * chunk
    if n_pad != n:
        # Rare-shape fallback; pad values are masked out in-kernel anyway.
        est = jnp.pad(est, (0, n_pad - n))
        gt = jnp.pad(gt, (0, n_pad - n))

    n_rows = n_pad // _LANES
    rows_cap_eff = max(sub, (rows_cap // sub) * sub)
    rows_block = min(rows_cap_eff, n_rows)
    n_tiles = pl.cdiv(n_rows, rows_block)
    needs_mask = (n_pad != n) or (n_rows % rows_block != 0)

    est2 = est.reshape(n_rows, _LANES)   # free reshape, native dtype
    gt2 = gt.reshape(n_rows, _LANES)

    kernel = functools.partial(
        _relate_loss_kernel,
        n_valid=n, rows_block=rows_block, needs_mask=needs_mask)

    sums = pl.pallas_call(
        kernel,
        out_shape=jax.ShapeDtypeStruct((3,), jnp.float32),
        grid_spec=pltpu.PrefetchScalarGridSpec(
            num_scalar_prefetch=0,
            grid=(2, n_tiles),
            in_specs=[
                pl.BlockSpec((rows_block, _LANES), lambda p, t: (t, 0)),
                pl.BlockSpec((rows_block, _LANES), lambda p, t: (t, 0)),
            ],
            out_specs=pl.BlockSpec(memory_space=pltpu.MemorySpace.SMEM),
            scratch_shapes=[
                pltpu.VMEM((8, _LANES), jnp.float32),   # acc_e
                pltpu.VMEM((8, _LANES), jnp.float32),   # acc_g
                pltpu.VMEM((8, _LANES), jnp.float32),   # acc_d
                pltpu.VMEM((8, _LANES), jnp.float32),   # acc_d2
                pltpu.VMEM((8, _LANES), jnp.float32),   # acc_c
                pltpu.SMEM((1,), jnp.float32),          # scale
            ],
        ),
        compiler_params=pltpu.CompilerParams(
            # Shared accumulators => grid must stay sequential on one TC.
            dimension_semantics=("arbitrary", "arbitrary"),
            vmem_limit_bytes=32 * 1024 * 1024,
        ),
    )(est2, gt2)

    sum_d, sum_sq, cnt = sums[0], sums[1], sums[2]
    mean_d = sum_d / cnt
    mean_sq = sum_sq / cnt
    # loss = sqrt(E[d^2] - lambd * E[d]^2)   (scalar glue outside the kernel)
    return jnp.sqrt(mean_sq - lambd * mean_d * mean_d)


def relate_loss_ref(depth_est, depth_gt, lambd=0.5):
    """Pure-JAX reference matching the PyTorch forward."""
    est = depth_est.reshape(-1).astype(jnp.float32)
    gt = depth_gt.reshape(-1).astype(jnp.float32)
    mask = gt > 0.0
    scale = (jnp.sum(jnp.where(mask, est, 0.0)) /
             jnp.sum(jnp.where(mask, gt, 0.0)))
    gt2 = gt * scale
    gt2 = jnp.where(gt2 < 0.0, 0.0, gt2)
    valid = gt2 > 1.0
    diff = (jnp.log(jnp.where(valid, gt2, 1.0)) -
            jnp.log(jnp.where(valid, est, 1.0)))
    cnt = jnp.sum(valid.astype(jnp.float32))
    m = jnp.sum(jnp.where(valid, diff, 0.0)) / cnt
    msq = jnp.sum(jnp.where(valid, diff * diff, 0.0)) / cnt
    return jnp.sqrt(msq - lambd * m * m)


if __name__ == "__main__":
    key = jax.random.PRNGKey(0)
    k1, k2, k3 = jax.random.split(key, 3)

    shape = (2, 1, 32, 32)  # small NCHW-style depth maps
    depth_est = jax.random.uniform(k1, shape, jnp.float32, 0.5, 10.0)
    gt_raw = jax.random.uniform(k2, shape, jnp.float32, 0.5, 10.0)
    holes = jax.random.bernoulli(k3, 0.3, shape)        # ~30% invalid pixels
    depth_gt = jnp.where(holes, 0.0, gt_raw)

    loss = relate_loss(depth_est, depth_gt, lambd=0.5)
    loss = jax.block_until_ready(loss)

    ref = jax.block_until_ready(relate_loss_ref(depth_est, depth_gt, lambd=0.5))
    assert jnp.isfinite(loss), f"non-finite loss: {loss}"
    assert jnp.allclose(loss, ref, rtol=1e-3, atol=1e-3), (loss, ref)

    print("KERNEL_OK")
</pallas_src>

<mosaic_0001>
module attributes {stable_mosaic.version = 11 : i64} {
  func.func @_relate_loss_kernel(%arg0: i32, %arg1: i32, %arg2: memref<16x128xf32, #tpu.memory_space<vmem>>, %arg3: memref<16x128xf32, #tpu.memory_space<vmem>>, %arg4: memref<3xf32, #tpu.memory_space<smem>>, %arg5: memref<8x128xf32, #tpu.memory_space<vmem>>, %arg6: memref<8x128xf32, #tpu.memory_space<vmem>>, %arg7: memref<8x128xf32, #tpu.memory_space<vmem>>, %arg8: memref<8x128xf32, #tpu.memory_space<vmem>>, %arg9: memref<8x128xf32, #tpu.memory_space<vmem>>, %arg10: memref<1xf32, #tpu.memory_space<smem>>) attributes {dimension_semantics = [#tpu.dimension_semantics<arbitrary>, #tpu.dimension_semantics<arbitrary>], iteration_bounds = array<i64: 2, 1>, scalar_prefetch = 0 : i64, scratch_operands = 6 : i64, tpu.core_type = #tpu.core_type<tc>, window_params = [{transform_indices = @transform_0, window_bounds = array<i64: 16, 128>}, {transform_indices = @transform_1, window_bounds = array<i64: 16, 128>}, {transform_indices = @transform_2, window_bounds = array<i64: 3>}]} {
    %c0_i32 = arith.constant 0 : i32
    %0 = arith.cmpi eq, %arg0, %c0_i32 : i32
    %c0_i32_0 = arith.constant 0 : i32
    %1 = arith.cmpi eq, %arg1, %c0_i32_0 : i32
    %2 = arith.andi %0, %1 : i1
    %3 = arith.extui %2 : i1 to i32
    %c0_i32_1 = arith.constant 0 : i32
    %4 = arith.cmpi ne, %3, %c0_i32_1 : i32
    scf.if %4 {
      %cst = arith.constant 0.000000e+00 : f32
      %23 = vector.broadcast %cst : f32 to vector<8x128xf32>
      %c0_14 = arith.constant 0 : index
      %c0_15 = arith.constant 0 : index
      %24 = vector.load %arg5[%c0_14, %c0_15] : memref<8x128xf32, #tpu.memory_space<vmem>>, vector<8x128xf32>
      tpu.vector_store %arg5[%c0_14, %c0_15], %23 {strides = array<i32>} : memref<8x128xf32, #tpu.memory_space<vmem>>, vector<8x128xf32>,
      %cst_16 = arith.constant 0.000000e+00 : f32
      %25 = vector.broadcast %cst_16 : f32 to vector<8x128xf32>
      %c0_17 = arith.constant 0 : index
      %c0_18 = arith.constant 0 : index
      %26 = vector.load %arg6[%c0_17, %c0_18] : memref<8x128xf32, #tpu.memory_space<vmem>>, vector<8x128xf32>
      tpu.vector_store %arg6[%c0_17, %c0_18], %25 {strides = array<i32>} : memref<8x128xf32, #tpu.memory_space<vmem>>, vector<8x128xf32>,
      %cst_19 = arith.constant 0.000000e+00 : f32
      %27 = vector.broadcast %cst_19 : f32 to vector<8x128xf32>
      %c0_20 = arith.constant 0 : index
      %c0_21 = arith.constant 0 : index
      %28 = vector.load %arg7[%c0_20, %c0_21] : memref<8x128xf32, #tpu.memory_space<vmem>>, vector<8x128xf32>
      tpu.vector_store %arg7[%c0_20, %c0_21], %27 {strides = array<i32>} : memref<8x128xf32, #tpu.memory_space<vmem>>, vector<8x128xf32>,
      %cst_22 = arith.constant 0.000000e+00 : f32
      %29 = vector.broadcast %cst_22 : f32 to vector<8x128xf32>
      %c0_23 = arith.constant 0 : index
      %c0_24 = arith.constant 0 : index
      %30 = vector.load %arg8[%c0_23, %c0_24] : memref<8x128xf32, #tpu.memory_space<vmem>>, vector<8x128xf32>
      tpu.vector_store %arg8[%c0_23, %c0_24], %29 {strides = array<i32>} : memref<8x128xf32, #tpu.memory_space<vmem>>, vector<8x128xf32>,
      %cst_25 = arith.constant 0.000000e+00 : f32
      %31 = vector.broadcast %cst_25 : f32 to vector<8x128xf32>
      %c0_26 = arith.constant 0 : index
      %c0_27 = arith.constant 0 : index
      %32 = vector.load %arg9[%c0_26, %c0_27] : memref<8x128xf32, #tpu.memory_space<vmem>>, vector<8x128xf32>
      tpu.vector_store %arg9[%c0_26, %c0_27], %31 {strides = array<i32>} : memref<8x128xf32, #tpu.memory_space<vmem>>, vector<8x128xf32>,
    } else {
    }
    %c0 = arith.constant 0 : index
    %c0_2 = arith.constant 0 : index
    %5 = vector.load %arg2[%c0, %c0_2] : memref<16x128xf32, #tpu.memory_space<vmem>>, vector<16x128xf32>
    %c0_3 = arith.constant 0 : index
    %c0_4 = arith.constant 0 : index
    %6 = vector.load %arg3[%c0_3, %c0_4] : memref<16x128xf32, #tpu.memory_space<vmem>>, vector<16x128xf32>
    %c0_i32_5 = arith.constant 0 : i32
    %7 = arith.cmpi eq, %arg0, %c0_i32_5 : i32
    %8 = arith.extui %7 : i1 to i32
    %c0_i32_6 = arith.constant 0 : i32
    %9 = arith.cmpi ne, %8, %c0_i32_6 : i32
    scf.if %9 {
      %cst = arith.constant 0.000000e+00 : f32
      %23 = vector.broadcast %cst : f32 to vector<16x128xf32>
      %24 = arith.cmpf ogt, %6, %23 : vector<16x128xf32>
      %c0_14 = arith.constant 0 : index
      %c0_15 = arith.constant 0 : index
      %25 = vector.load %arg5[%c0_14, %c0_15] : memref<8x128xf32, #tpu.memory_space<vmem>>, vector<8x128xf32>
      %cst_16 = arith.constant 0.000000e+00 : f32
      %26 = vector.broadcast %cst_16 : f32 to vector<16x128xf32>
      %27 = arith.select %24, %5, %26 : vector<16x128xi1>, vector<16x128xf32>
      %28 = vector.shape_cast %27 : vector<16x128xf32> to vector<2x8x128xf32>
      %cst_17 = arith.constant dense<0.000000e+00> : vector<8x128xf32>
      %29 = vector.multi_reduction <add>, %28, %cst_17 [0] : vector<2x8x128xf32> to vector<8x128xf32>
      %30 = arith.addf %25, %29 : vector<8x128xf32>
      %c0_18 = arith.constant 0 : index
      %c0_19 = arith.constant 0 : index
      %31 = vector.load %arg5[%c0_18, %c0_19] : memref<8x128xf32, #tpu.memory_space<vmem>>, vector<8x128xf32>
      tpu.vector_store %arg5[%c0_18, %c0_19], %30 {strides = array<i32>} : memref<8x128xf32, #tpu.memory_space<vmem>>, vector<8x128xf32>,
      %c0_20 = arith.constant 0 : index
      %c0_21 = arith.constant 0 : index
      %32 = vector.load %arg6[%c0_20, %c0_21] : memref<8x128xf32, #tpu.memory_space<vmem>>, vector<8x128xf32>
      %cst_22 = arith.constant 0.000000e+00 : f32
      %33 = vector.broadcast %cst_22 : f32 to vector<16x128xf32>
      %34 = arith.select %24, %6, %33 : vector<16x128xi1>, vector<16x128xf32>
      %35 = vector.shape_cast %34 : vector<16x128xf32> to vector<2x8x128xf32>
      %cst_23 = arith.constant dense<0.000000e+00> : vector<8x128xf32>
      %36 = vector.multi_reduction <add>, %35, %cst_23 [0] : vector<2x8x128xf32> to vector<8x128xf32>
      %37 = arith.addf %32, %36 : vector<8x128xf32>
      %c0_24 = arith.constant 0 : index
      %c0_25 = arith.constant 0 : index
      %38 = vector.load %arg6[%c0_24, %c0_25] : memref<8x128xf32, #tpu.memory_space<vmem>>, vector<8x128xf32>
      tpu.vector_store %arg6[%c0_24, %c0_25], %37 {strides = array<i32>} : memref<8x128xf32, #tpu.memory_space<vmem>>, vector<8x128xf32>,
    } else {
    }
    %c1_i32 = arith.constant 1 : i32
    %10 = arith.cmpi eq, %arg0, %c1_i32 : i32
    %c0_i32_7 = arith.constant 0 : i32
    %11 = arith.cmpi eq, %arg1, %c0_i32_7 : i32
    %12 = arith.andi %10, %11 : i1
    %13 = arith.extui %12 : i1 to i32
    %c0_i32_8 = arith.constant 0 : i32
    %14 = arith.cmpi ne, %13, %c0_i32_8 : i32
    scf.if %14 {
      %c0_14 = arith.constant 0 : index
      %c0_15 = arith.constant 0 : index
      %23 = vector.load %arg5[%c0_14, %c0_15] : memref<8x128xf32, #tpu.memory_space<vmem>>, vector<8x128xf32>
      %24 = vector.shape_cast %23 : vector<8x128xf32> to vector<1x8x128xf32>
      %cst = arith.constant dense<0.000000e+00> : vector<1xf32>
      %25 = vector.multi_reduction <add>, %24, %cst [1, 2] : vector<1x8x128xf32> to vector<1xf32>
      %26 = vector.shape_cast %25 : vector<1xf32> to vector<1x1x1xf32>
      %27 = vector.extract %26[0, 0, 0] : f32 from vector<1x1x1xf32>
      %c0_16 = arith.constant 0 : index
      %c0_17 = arith.constant 0 : index
      %28 = vector.load %arg6[%c0_16, %c0_17] : memref<8x128xf32, #tpu.memory_space<vmem>>, vector<8x128xf32>
      %29 = vector.shape_cast %28 : vector<8x128xf32> to vector<1x8x128xf32>
      %cst_18 = arith.constant dense<0.000000e+00> : vector<1xf32>
      %30 = vector.multi_reduction <add>, %29, %cst_18 [1, 2] : vector<1x8x128xf32> to vector<1xf32>
      %31 = vector.shape_cast %30 : vector<1xf32> to vector<1x1x1xf32>
      %32 = vector.extract %31[0, 0, 0] : f32 from vector<1x1x1xf32>
      %33 = arith.divf %27, %32 : f32
      %c0_19 = arith.constant 0 : index
      %34 = memref.load %arg10[%c0_19] : memref<1xf32, #tpu.memory_space<smem>>
      memref.store %33, %arg10[%c0_19] : memref<1xf32, #tpu.memory_space<smem>>
    } else {
    }
    %c1_i32_9 = arith.constant 1 : i32
    %15 = arith.cmpi eq, %arg0, %c1_i32_9 : i32
    %16 = arith.extui %15 : i1 to i32
    %c0_i32_10 = arith.constant 0 : i32
    %17 = arith.cmpi ne, %16, %c0_i32_10 : i32
    scf.if %17 {
      %c0_14 = arith.constant 0 : index
      %23 = memref.load %arg10[%c0_14] : memref<1xf32, #tpu.memory_space<smem>>
      %24 = vector.broadcast %23 : f32 to vector<16x128xf32>
      %25 = arith.mulf %6, %24 : vector<16x128xf32>
      %cst = arith.constant 0.000000e+00 : f32
      %26 = vector.broadcast %cst : f32 to vector<16x128xf32>
      %27 = arith.cmpf olt, %25, %26 : vector<16x128xf32>
      %cst_15 = arith.constant 0.000000e+00 : f32
      %28 = vector.broadcast %cst_15 : f32 to vector<16x128xf32>
      %29 = arith.select %27, %28, %25 : vector<16x128xi1>, vector<16x128xf32>
      %cst_16 = arith.constant 1.000000e+00 : f32
      %30 = vector.broadcast %cst_16 : f32 to vector<16x128xf32>
      %31 = arith.cmpf ogt, %29, %30 : vector<16x128xf32>
      %cst_17 = arith.constant 1.000000e+00 : f32
      %32 = vector.broadcast %cst_17 : f32 to vector<16x128xf32>
      %33 = arith.select %31, %29, %32 : vector<16x128xi1>, vector<16x128xf32>
      %cst_18 = arith.constant 1.000000e+00 : f32
      %34 = vector.broadcast %cst_18 : f32 to vector<16x128xf32>
      %35 = arith.select %31, %5, %34 : vector<16x128xi1>, vector<16x128xf32>
      %36 = math.log %33 : vector<16x128xf32>
      %37 = math.log %35 : vector<16x128xf32>
      %38 = arith.subf %36, %37 : vector<16x128xf32>
      %cst_19 = arith.constant 0.000000e+00 : f32
      %39 = vector.broadcast %cst_19 : f32 to vector<16x128xf32>
      %40 = arith.select %31, %38, %39 : vector<16x128xi1>, vector<16x128xf32>
      %c0_20 = arith.constant 0 : index
      %c0_21 = arith.constant 0 : index
      %41 = vector.load %arg7[%c0_20, %c0_21] : memref<8x128xf32, #tpu.memory_space<vmem>>, vector<8x128xf32>
      %42 = vector.shape_cast %40 : vector<16x128xf32> to vector<2x8x128xf32>
      %cst_22 = arith.constant dense<0.000000e+00> : vector<8x128xf32>
      %43 = vector.multi_reduction <add>, %42, %cst_22 [0] : vector<2x8x128xf32> to vector<8x128xf32>
      %44 = arith.addf %41, %43 : vector<8x128xf32>
      %c0_23 = arith.constant 0 : index
      %c0_24 = arith.constant 0 : index
      %45 = vector.load %arg7[%c0_23, %c0_24] : memref<8x128xf32, #tpu.memory_space<vmem>>, vector<8x128xf32>
      tpu.vector_store %arg7[%c0_23, %c0_24], %44 {strides = array<i32>} : memref<8x128xf32, #tpu.memory_space<vmem>>, vector<8x128xf32>,
      %c0_25 = arith.constant 0 : index
      %c0_26 = arith.constant 0 : index
      %46 = vector.load %arg8[%c0_25, %c0_26] : memref<8x128xf32, #tpu.memory_space<vmem>>, vector<8x128xf32>
      %47 = arith.mulf %40, %38 : vector<16x128xf32>
      %48 = vector.shape_cast %47 : vector<16x128xf32> to vector<2x8x128xf32>
      %cst_27 = arith.constant dense<0.000000e+00> : vector<8x128xf32>
      %49 = vector.multi_reduction <add>, %48, %cst_27 [0] : vector<2x8x128xf32> to vector<8x128xf32>
      %50 = arith.addf %46, %49 : vector<8x128xf32>
      %c0_28 = arith.constant 0 : index
      %c0_29 = arith.constant 0 : index
      %51 = vector.load %arg8[%c0_28, %c0_29] : memref<8x128xf32, #tpu.memory_space<vmem>>, vector<8x128xf32>
      tpu.vector_store %arg8[%c0_28, %c0_29], %50 {strides = array<i32>} : memref<8x128xf32, #tpu.memory_space<vmem>>, vector<8x128xf32>,
      %c0_30 = arith.constant 0 : index
      %c0_31 = arith.constant 0 : index
      %52 = vector.load %arg9[%c0_30, %c0_31] : memref<8x128xf32, #tpu.memory_space<vmem>>, vector<8x128xf32>
      %53 = arith.extui %31 : vector<16x128xi1> to vector<16x128xi32>
      %54 = arith.sitofp %53 : vector<16x128xi32> to vector<16x128xf32>
      %55 = vector.shape_cast %54 : vector<16x128xf32> to vector<2x8x128xf32>
      %cst_32 = arith.constant dense<0.000000e+00> : vector<8x128xf32>
      %56 = vector.multi_reduction <add>, %55, %cst_32 [0] : vector<2x8x128xf32> to vector<8x128xf32>
      %57 = arith.addf %52, %56 : vector<8x128xf32>
      %c0_33 = arith.constant 0 : index
      %c0_34 = arith.constant 0 : index
      %58 = vector.load %arg9[%c0_33, %c0_34] : memref<8x128xf32, #tpu.memory_space<vmem>>, vector<8x128xf32>
      tpu.vector_store %arg9[%c0_33, %c0_34], %57 {strides = array<i32>} : memref<8x128xf32, #tpu.memory_space<vmem>>, vector<8x128xf32>,
    } else {
    }
    %c1_i32_11 = arith.constant 1 : i32
    %18 = arith.cmpi eq, %arg0, %c1_i32_11 : i32
    %c0_i32_12 = arith.constant 0 : i32
    %19 = arith.cmpi eq, %arg1, %c0_i32_12 : i32
    %20 = arith.andi %18, %19 : i1
    %21 = arith.extui %20 : i1 to i32
    %c0_i32_13 = arith.constant 0 : i32
    %22 = arith.cmpi ne, %21, %c0_i32_13 : i32
    scf.if %22 {
      %c0_14 = arith.constant 0 : index
      %c0_15 = arith.constant 0 : index
      %23 = vector.load %arg7[%c0_14, %c0_15] : memref<8x128xf32, #tpu.memory_space<vmem>>, vector<8x128xf32>
      %24 = vector.shape_cast %23 : vector<8x128xf32> to vector<1x8x128xf32>
      %cst = arith.constant dense<0.000000e+00> : vector<1xf32>
      %25 = vector.multi_reduction <add>, %24, %cst [1, 2] : vector<1x8x128xf32> to vector<1xf32>
      %26 = vector.shape_cast %25 : vector<1xf32> to vector<1x1x1xf32>
      %27 = vector.extract %26[0, 0, 0] : f32 from vector<1x1x1xf32>
      %c0_16 = arith.constant 0 : index
      %28 = memref.load %arg4[%c0_16] : memref<3xf32, #tpu.memory_space<smem>>
      memref.store %27, %arg4[%c0_16] : memref<3xf32, #tpu.memory_space<smem>>
      %c0_17 = arith.constant 0 : index
      %c0_18 = arith.constant 0 : index
      %29 = vector.load %arg8[%c0_17, %c0_18] : memref<8x128xf32, #tpu.memory_space<vmem>>, vector<8x128xf32>
      %30 = vector.shape_cast %29 : vector<8x128xf32> to vector<1x8x128xf32>
      %cst_19 = arith.constant dense<0.000000e+00> : vector<1xf32>
      %31 = vector.multi_reduction <add>, %30, %cst_19 [1, 2] : vector<1x8x128xf32> to vector<1xf32>
      %32 = vector.shape_cast %31 : vector<1xf32> to vector<1x1x1xf32>
      %33 = vector.extract %32[0, 0, 0] : f32 from vector<1x1x1xf32>
      %c1 = arith.constant 1 : index
      %34 = memref.load %arg4[%c1] : memref<3xf32, #tpu.memory_space<smem>>
      memref.store %33, %arg4[%c1] : memref<3xf32, #tpu.memory_space<smem>>
      %c0_20 = arith.constant 0 : index
      %c0_21 = arith.constant 0 : index
      %35 = vector.load %arg9[%c0_20, %c0_21] : memref<8x128xf32, #tpu.memory_space<vmem>>, vector<8x128xf32>
      %36 = vector.shape_cast %35 : vector<8x128xf32> to vector<1x8x128xf32>
      %cst_22 = arith.constant dense<0.000000e+00> : vector<1xf32>
      %37 = vector.multi_reduction <add>, %36, %cst_22 [1, 2] : vector<1x8x128xf32> to vector<1xf32>
      %38 = vector.shape_cast %37 : vector<1xf32> to vector<1x1x1xf32>
      %39 = vector.extract %38[0, 0, 0] : f32 from vector<1x1x1xf32>
      %c2 = arith.constant 2 : index
      %40 = memref.load %arg4[%c2] : memref<3xf32, #tpu.memory_space<smem>>
      memref.store %39, %arg4[%c2] : memref<3xf32, #tpu.memory_space<smem>>
    } else {
    }
    return
  }
  func.func @transform_0(%arg0: i32, %arg1: i32) -> (i32, i32) {
    %c0_i32 = arith.constant 0 : i32
    %c0_i32_0 = arith.constant 0 : i32
    return %arg1, %c0_i32 : i32, i32
  }
  func.func @transform_1(%arg0: i32, %arg1: i32) -> (i32, i32) {
    %c0_i32 = arith.constant 0 : i32
    %c0_i32_0 = arith.constant 0 : i32
    return %arg1, %c0_i32 : i32, i32
  }
  func.func @transform_2(%arg0: i32, %arg1: i32) -> i32 {
    %c0_i32 = arith.constant 0 : i32
    %c0_i32_0 = arith.constant 0 : i32
    return %c0_i32 : i32
  }
}

</mosaic_0001>

<bundles_post_ra>
// kernel: relate_loss.1
= control target key start
LH: loop header
LB: loop body
LE: loop exit
PB: predicated region body
PF: predicated region fallthrough
CT: control target
= control target key end

     0   :  { %7 = vsyncpa [#allocation9], 0  ;;  %s533_s9 = smov 0   ;;  %s535_s10 = smov 0   ;;  %s614_s0 = inlined_call_operand.vmem [shape: f32[16,128], index: 0, kind: input, shape index: {}]   ;;  %s615_s1 = inlined_call_operand.vmem [shape: f32[16,128], index: 1, kind: input, shape index: {}]   ;;  %s616_s2 = inlined_call_operand.vmem [shape: f32[3], index: 2, kind: output, shape index: {}]  }
   0x1   :  { %s537_s11 = smov 0  }
   0x2 LB: > { %s401_s12 = sadd.s32 4294967295, %s513_s11   ;;  %s25_s13 = sadd.s32 1, %s509_s10  ;;  %s513_s11 = sphi %s537_s11, %s13_s11   ;;  %s509_s10 = sphi %s535_s10, %s618_s10   ;;  %s505_s9 = sphi %s533_s9, %s617_s9  }
   0x3   : > { %p27_p0 = scmp.ge.s32.totalorder %s25_s13, 2  ;;  %p405_p1 = scmp.ge.s32.totalorder %s513_s11, 1 }
   0x4   : > { %p132_p2 = scmp.lt.s32.totalorder %s513_s11, 3 }
   0x5   : > { %s620_s13 = smov (%p27_p0, %s25_s13), 0 }
   0x6   : > { %p133_p3 = pnand %p405_p1, %p132_p2 }
   0x7   : > { %p166_p4 = scmp.eq.s32.totalorder (!%p133_p3), %s505_s9, 0 }
   0x8   : > { %136 = sbr.rel (%p133_p3) target bundleno = 532 (0x214), region = 28 }
   0xd   : > { %171 = sbr.rel (!%p166_p4) target bundleno = 19 (0x13), region = 32  ;;  %v515_v0 = vmov (%p166_p4), 0.0  }
   0xe   : > { %172 = vst [vmem:[#allocation2] sm:$0xff] (%p166_p4), %v515_v0 }
   0xf   : > { %173 = vst [vmem:[#allocation3] sm:$0xff] (%p166_p4), %v515_v0 }
  0x10   : > { %174 = vst [vmem:[#allocation4] sm:$0xff] (%p166_p4), %v515_v0 }
  0x11   : > { %175 = vst [vmem:[#allocation5] sm:$0xff] (%p166_p4), %v515_v0 }
  0x12   : > { %176 = vst [vmem:[#allocation6] sm:$0xff] %v515_v0 }
  0x13 PF: > { %v558_v1 = vld [vmem:[%s614_s0] sm:$0xff]  ;;  %v563_v2 = vld [vmem:[%s614_s0 + $0x8] sm:$0xff]  ;;  %p407_p5 = scmp.ne.s32.totalorder %s505_s9, 0 }
  0x14   : > { %v568_v3 = vld [vmem:[%s615_s1] sm:$0xff]  ;;  %v573_v4 = vld [vmem:[%s615_s1 + $0x8] sm:$0xff] }
  0x15   : > { %183 = sbr.rel (%p407_p5) target bundleno = 34 (0x22), region = 36 }
  0x1a   : > { %vm184_vm0 = vcmp.gt.f32.partialorder %v568_v3, 0.0  ;;  %vm185_vm1 = vcmp.gt.f32.partialorder %v573_v4, 0.0  ;;  %v186_v5 = vld [vmem:[#allocation2] sm:$0xff]  ;;  %v192_v8 = vld [vmem:[#allocation3] sm:$0xff] }
  0x1b   : > { %v187_v6 = vsel %vm184_vm0, %v558_v1, 0.0  ;;  %v188_v7 = vsel %vm185_vm1, %v563_v2, 0.0  ;;  %v193_v9 = vsel %vm184_vm0, %v568_v3, 0.0  ;;  %v194_v10 = vsel %vm185_vm1, %v573_v4, 0.0 }
  0x1c   : > { %v189_v11 = vadd.f32 %v188_v7, %v187_v6  ;;  %v195_v12 = vadd.f32 %v194_v10, %v193_v9 }
  0x1e   : > { %v190_v13 = vadd.f32 %v189_v11, %v186_v5  ;;  %v196_v14 = vadd.f32 %v195_v12, %v192_v8 }
  0x20   : > { %191 = vst [vmem:[#allocation2] sm:$0xff] %v190_v13 }
  0x21   : > { %197 = vst [vmem:[#allocation3] sm:$0xff] %v196_v14 }
  0x22 PF: > { %p198_p6 = scmp.eq.s32.totalorder %s505_s9, 1 }
  0x24   : > { %202 = sbr.rel (!%p198_p6) target bundleno = 297 (0x129), region = 40 }
  0x27   : > { %v203_v15 = vld [vmem:[#allocation2] sm:$0xff] (%p198_p6) }
  0x28   : > { %204 = vadd.xlane.f32.xlu0 (%p198_p6), %v203_v15  ;;  %v213_v16 = vld [vmem:[#allocation3] sm:$0xff] (%p198_p6) }
  0x30   : > { %214 = vadd.xlane.f32.xlu0 %v213_v16 }
  0x9b   : > { %v205_v17 = vpop.xlane.xlu0 %204 }
  0x9c   : > { %v206_v18 = vrot.slane %v205_v17, 4 }
  0x9e   : > { %v207_v19 = vadd.f32 %v206_v18, %v205_v17 }
  0xa0   : > { %v208_v20 = vrot.slane %v207_v19, 2 }
  0xa2   : > { %v209_v21 = vadd.f32 %v208_v20, %v207_v19 }
  0xa3   : > { %v215_v22 = vpop.xlane.xlu0 %214 }
  0xa4   : > { %v216_v23 = vrot.slane %v215_v22, 4  ;;  %v210_v24 = vrot.slane %v209_v21, 1 }
  0xa6   : > { %v217_v25 = vadd.f32 %v216_v23, %v215_v22  ;;  %v211_v26 = vadd.f32 %v210_v24, %v209_v21 }
  0xa8   : > { %v218_v27 = vrot.slane %v217_v25, 2  ;;  %418 = vpush %v211_v26 }
  0xaa   : > { %v219_v28 = vadd.f32 %v218_v27, %v217_v25 }
  0xac   : > { %v220_v29 = vrot.slane %v219_v28, 1 }
  0xae   : > { %v221_v30 = vadd.f32 %v220_v29, %v219_v28 }
  0xb0   : > { %420 = vpush %v221_v30 }
  0xd9   : > { %s419_s22 = spop %418 }
  0xe1   : > { %s421_s23 = spop %420 }
  0xe2   : > { %v223_v31 = vstv %s421_s23 }
  0xe3   : > { %463 = vrcp.f32 %v223_v31  ;;  %v235_v35 = vand.u32 2147483648, %v223_v31  ;;  %v233_v37 = vand.u32 2147483647, %v223_v31  ;;  %vm229_vm3 = vweird.f32 %v223_v31 }
  0xe5   : > { %v236_v39 = vor.u32 1.1754944e-38, %v235_v35  ;;  %vm234_vm5 = vcmp.eq.f32.partialorder %v233_v37, 8.507059e+37 }
  0xe9   : > { %v464_v32 = vpop.eup %463 }
  0xea   : > { %v225_v33 = vmul.f32 %v464_v32, %v223_v31  ;;  %vm230_vm2 = vweird.f32 %v464_v32 }
  0xeb   : > { %vm231_vm4 = vmor %vm229_vm3, %vm230_vm2 }
  0xec   : > { %v226_v34 = vsub.f32 1.0, %v225_v33 }
  0xee   : > { %v227_v36 = vmul.f32 %v464_v32, %v226_v34 }
  0xf0   : > { %v228_v38 = vadd.f32 %v464_v32, %v227_v36 }
  0xf2   : > { %v232_v40 = vsel %vm231_vm4, %v464_v32, %v228_v38 }
  0xf3   : > { %v237_v41 = vsel %vm234_vm5, %v236_v39, %v232_v40 }
  0xf4   : > { %422 = vpush %v237_v41 }
 0x125   : > { %s423_s24 = spop %422 }
 0x126   : > { %s239_s25 = smul.f32 %s423_s24, %s419_s22 }
 0x128   : > { %241 = sst [smem:[#allocation7]] %s239_s25 }
 0x129 PF: > { %p409_p7 = scmp.ne.s32.totalorder %s505_s9, 1 }
 0x12a   : > { %s245_s26 = sld [smem:[#allocation7]] (!%p409_p7) }
 0x12b   : > { %244 = sbr.rel (%p409_p7) target bundleno = 333 (0x14d), region = 44 }
 0x130   : > { %v246_v42 = vstv %s245_s26  ;;  %v281_v51 = vld [vmem:[#allocation6] sm:$0xff]  ;;  %v516_v52 = vmov 0.0   ;;  %v271_v5 = vld [vmem:[#allocation4] sm:$0xff]  ;;  %v275_v9 = vld [vmem:[#allocation5] sm:$0xff] }
 0x131   : > { %v247_v43 = vmul.f32 %v246_v42, %v568_v3  ;;  %v248_v44 = vmul.f32 %v246_v42, %v573_v4 }
 0x133   : > { %vm249_vm6 = vcmp.lt.f32.partialorder %v247_v43, 0.0  ;;  %vm250_vm7 = vcmp.lt.f32.partialorder %v248_v44, 0.0 }
 0x134   : > { %v251_v45 = vsel %vm249_vm6, 0.0, %v247_v43  ;;  %v252_v46 = vsel %vm250_vm7, 0.0, %v248_v44 }
 0x135   : > { %vm253_vm8 = vcmp.gt.f32.partialorder %v251_v45, 1.0  ;;  %vm254_vm9 = vcmp.gt.f32.partialorder %v252_v46, 1.0 }
 0x136   : > { %v255_v47 = vsel %vm253_vm8, %v251_v45, 1.0  ;;  %v256_v48 = vsel %vm254_vm9, %v252_v46, 1.0  ;;  %v257_v49 = vsel %vm253_vm8, %v558_v1, 1.0  ;;  %v258_v50 = vsel %vm254_vm9, %v563_v2, 1.0 }
 0x137   : > { %465 = vlog2.f32 %v255_v47  ;;  %v410_v53 = vsel %vm253_vm8, 1.0, %v516_v52  ;;  %v411_v54 = vsel %vm254_vm9, 1.0, %v516_v52 }
 0x138   : > { %467 = vlog2.f32 %v256_v48  ;;  %v286_v55 = vadd.f32 %v411_v54, %v410_v53 }
 0x139   : > { %469 = vlog2.f32 %v257_v49 }
 0x13a   : > { %471 = vlog2.f32 %v258_v50  ;;  %v287_v56 = vadd.f32 %v286_v55, %v281_v51 }
 0x13c   : > { %288 = vst [vmem:[#allocation6] sm:$0xff] %v287_v56 }
 0x13d   : > { %v466_v57 = vpop.eup %465 }
 0x13e   : > { %v468_v58 = vpop.eup %467  ;;  %v260_v59 = vmul.f32 0.6931472, %v466_v57 }
 0x13f   : > { %v470_v60 = vpop.eup %469  ;;  %v262_v61 = vmul.f32 0.6931472, %v468_v58 }
 0x140   : > { %v472_v62 = vpop.eup %471  ;;  %v264_v63 = vmul.f32 0.6931472, %v470_v60 }
 0x141   : > { %v266_v0 = vmul.f32 0.6931472, %v472_v62 }
 0x142   : > { %v267_v1 = vsub.f32 %v260_v59, %v264_v63 }
 0x143   : > { %v268_v2 = vsub.f32 %v262_v61, %v266_v0 }
 0x144   : > { %v269_v3 = vsel %vm253_vm8, %v267_v1, 0.0 }
 0x145   : > { %v270_v4 = vsel %vm254_vm9, %v268_v2, 0.0  ;;  %v276_v6 = vmul.f32 %v269_v3, %v267_v1 }
 0x146   : > { %v272_v7 = vadd.f32 %v270_v4, %v269_v3  ;;  %v277_v8 = vmul.f32 %v270_v4, %v268_v2 }
 0x148   : > { %v273_v10 = vadd.f32 %v272_v7, %v271_v5  ;;  %v278_v11 = vadd.f32 %v277_v8, %v276_v6 }
 0x14a   : > { %274 = vst [vmem:[#allocation4] sm:$0xff] %v273_v10  ;;  %v279_v12 = vadd.f32 %v278_v11, %v275_v9 }
 0x14c   : > { %280 = vst [vmem:[#allocation5] sm:$0xff] %v279_v12 }
 0x14d PF: > { %290 = sbr.rel (!%p198_p6) target bundleno = 526 (0x20e), region = 48  ;;  %v315_v14 = vld [vmem:[#allocation6] sm:$0xff] (%p198_p6) }
 0x14e   : > { %316 = vadd.xlane.f32.xlu1 (%p198_p6), %v315_v14 }
 0x151   : > { %v291_v13 = vld [vmem:[#allocation4] sm:$0xff] (%p198_p6) }
 0x152   : > { %292 = vadd.xlane.f32.xlu0 %v291_v13 }
 0x153   : > { %v303_v15 = vld [vmem:[#allocation5] sm:$0xff] }
 0x15a   : > { %304 = vadd.xlane.f32.xlu0 %v303_v15 }
 0x1c1   : > { %v317_v17 = vpop.xlane.xlu1 %316 }
 0x1c2   : > { %v318_v19 = vrot.slane %v317_v17, 4 }
 0x1c4   : > { %v319_v21 = vadd.f32 %v318_v19, %v317_v17 }
 0x1c5   : > { %v293_v16 = vpop.xlane.xlu0 %292 }
 0x1c6   : > { %v294_v18 = vrot.slane %v293_v16, 4  ;;  %v320_v24 = vrot.slane %v319_v21, 2 }
 0x1c8   : > { %v295_v20 = vadd.f32 %v294_v18, %v293_v16  ;;  %v321_v30 = vadd.f32 %v320_v24, %v319_v21 }
 0x1ca   : > { %v296_v22 = vrot.slane %v295_v20, 2  ;;  %v322_v33 = vrot.slane %v321_v30, 1 }
 0x1cc   : > { %v297_v23 = vadd.f32 %v296_v22, %v295_v20  ;;  %v323_v36 = vadd.f32 %v322_v33, %v321_v30 }
 0x1cd   : > { %v305_v25 = vpop.xlane.xlu0 %304 }
 0x1ce   : > { %v306_v26 = vrot.slane %v305_v25, 4  ;;  %v298_v27 = vrot.slane %v297_v23, 1 }
 0x1d0   : > { %v307_v28 = vadd.f32 %v306_v26, %v305_v25  ;;  %v299_v29 = vadd.f32 %v298_v27, %v297_v23 }
 0x1d2   : > { %v308_v31 = vrot.slane %v307_v28, 2  ;;  %424 = vpush %v299_v29 }
 0x1d4   : > { %v309_v32 = vadd.f32 %v308_v31, %v307_v28 }
 0x1d6   : > { %v310_v34 = vrot.slane %v309_v32, 1 }
 0x1d8   : > { %v311_v35 = vadd.f32 %v310_v34, %v309_v32 }
 0x1da   : > { %426 = vpush %v311_v35 }
 0x1db   : > { %428 = vpush %v323_v36 }
 0x203   : > { %s425_s27 = spop %424 }
 0x204   : > { %302 = sst [smem:[#allocation8]] %s425_s27 }
 0x20b   : > { %s427_s28 = spop %426 }
 0x20c   : > { %314 = sst [smem:[#allocation8 + $0x1]] %s427_s28  ;;  %s429_s29 = spop %428 }
 0x20d   : > { %326 = sst [smem:[#allocation8 + $0x2]] %s429_s29 }
 0x20e PF: > { %p434_p8 = scmp.eq.s32.totalorder %s401_s12, 1  ;;  %s333_s4 = sshll.u32 %s616_s2, 4  ;;  %s334_s4 = int_to_ptr.vmem [resolvable:$true] %s333_s4 }
 0x20f   : > { %s517_s5 = smov [#allocation8]  }
 0x210   : > { %431 = dma.smem_to_vmem (%p434_p8), %s517_s5, 16, %s334_s4, [#allocation9]  }
 0x211   : > { %500 = dma.done.wait (%p434_p8), [#allocation9], 16  }
 0x212   : > { %502 = vsyncadd (%p434_p8), [#allocation9], 4294967280 }
 0x213   : > { %342 = sfence }
 0x214 PF: > { %s13_s11 = sadd.s32 1, %s513_s11   ;;  %s617_s9 = smov %s509_s10 }
 0x215   : > { %p10_p9 = scmp.ge.s32.totalorder %s13_s11, 4   ;;  %s618_s10 = smov %s620_s13 }
 0x217   :  { %12 = sbr.rel (!%p10_p9) target bundleno = 2 (0x2), region = 82 }
 0x21c   :  { %348 = vsyncpa [#allocation9], 1 }
 0x21d   :  { %350 = vsyncpa [#allocation9 + $0x1], 1 }

</bundles_post_ra>
